<compile_context>
chip_gen: v5e
topology: v5e:2x2
jax: 0.10.0
libtpu: 0.0.40
codegen_flags: <defaults>
</compile_context>

<pallas_src>
from functools import partial

import jax
import jax.numpy as jnp
from jax import lax
from jax.experimental import pallas as pl
from jax.experimental.pallas import tpu as pltpu


def _getattr_int(obj, names):
    for name in names:
        v = getattr(obj, name, None)
        if v is None:
            continue
        try:
            iv = int(v)
        except (TypeError, ValueError):
            continue
        if iv > 0:
            return iv
    return None


def _chip_resources():
    """Return (num_tensorcores, vmem_capacity_bytes) with safe fallbacks."""
    cores = 1
    vmem_cap = 64 * 1024 * 1024     # conservative default (v7x per-TC VMEM)
    try:
        info = pltpu.get_tpu_info()
        v = _getattr_int(info, ("vmem_capacity_bytes", "vmem_bytes"))
        if v is not None:
            vmem_cap = v
        c = _getattr_int(info, ("num_cores", "tensorcore_count",
                                "num_tensorcores", "cores_per_chip",
                                "core_count"))
        if c is not None:
            cores = c
    except Exception:
        pass
    if cores == 1:
        try:
            kind = jax.devices()[0].device_kind.lower()
            if "v7" in kind or "7x" in kind:
                cores = 2
        except Exception:
            pass
    return cores, vmem_cap


def _bce_smooth_kernel(x_ref, tgt_ref, out_ref, acc_ref, *,
                       smoothing: float, n_rows: int, block_n: int,
                       steps: int, two_d: bool):
    # x_ref:   (BLOCK_N, C) float logits tile in VMEM
    # tgt_ref: (BLOCK_N, 1) int32 class-index tile in VMEM
    # out_ref: (1, 8, 128)  f32 per-split partial-sum tile in VMEM
    # acc_ref: (8, C)       f32 per-core accumulator (VMEM scratch)
    if two_d:
        g = pl.program_id(0)   # parallel split (megacore)
        s = pl.program_id(1)   # reduction step within the split
    else:
        g = 0
        s = pl.program_id(0)

    @pl.when(s == 0)
    def _init():
        acc_ref[...] = jnp.zeros_like(acc_ref)

    x = x_ref[...].astype(jnp.float32)      # (BLOCK_N, C)
    tgt = tgt_ref[...]                      # (BLOCK_N, 1) int32
    bn, c = x.shape

    off_value = smoothing / c
    on_value = 1.0 - smoothing + off_value

    # one-hot with label smoothing (scatter_ equivalent via iota compare)
    col = lax.broadcasted_iota(jnp.int32, (bn, c), 1)
    t = jnp.where(col == tgt, on_value, off_value).astype(jnp.float32)

    # numerically stable binary_cross_entropy_with_logits, elementwise
    loss = jnp.maximum(x, 0.0) - x * t + jnp.log1p(jnp.exp(-jnp.abs(x)))

    tile_start = (g * steps + s) * block_n

    # Fast path: tile fully inside [0, n_rows): no masking work at all.
    @pl.when(tile_start + block_n <= n_rows)
    def _accum_fast():
        acc_ref[...] += jnp.sum(loss.reshape(bn // 8, 8, c), axis=0)

    # Slow path: last partial tile / clamped out-of-range tail slot.
    @pl.when(tile_start + block_n > n_rows)
    def _accum_masked():
        row = lax.broadcasted_iota(jnp.int32, (bn, 1), 0) + tile_start
        masked = jnp.where(row < n_rows, loss, 0.0)
        acc_ref[...] += jnp.sum(masked.reshape(bn // 8, 8, c), axis=0)

    @pl.when(s == steps - 1)
    def _finalize():
        part_sum = jnp.sum(acc_ref[...])    # single small XLU reduce per split
        out_ref[...] = jnp.full(out_ref.shape, part_sum, dtype=out_ref.dtype)


def binary_cross_entropy(x: jax.Array, target: jax.Array,
                         smoothing: float = 0.1, *,
                         block_n: int | None = None) -> jax.Array:
    """Forward of BinaryCrossEntropy(smoothing=0.1, reduction='mean',
    target_threshold=None, weight=None, pos_weight=None).

    x:      (N, C) float logits (f32 or bf16)
    target: (N,)   integer class indices
    returns scalar mean loss (cast back to x.dtype).
    """
    assert x.shape[0] == target.shape[0]
    n, c = x.shape
    tgt2d = target.astype(jnp.int32).reshape(n, 1)
    itemsize = jnp.dtype(x.dtype).itemsize

    cores, vmem_cap = _chip_resources()

    # Lane-padded per-row VMEM bytes (the real DMA-buffer footprint).
    c_pad = ((c + 127) // 128) * 128
    row_bytes_x = c_pad * itemsize          # logits buffer bytes per row
    row_bytes_t = 128 * 4                   # (bn,1) int32 lane-pads to (bn,128)
    n_pad8 = ((n + 7) // 8) * 8

    if block_n is None:
        # ~8 MiB (padded) per input buffer on 128 MiB-VMEM chips (v5e/v6e),
        # ~4 MiB on 64 MiB chips (v7x); includes the padded target buffer.
        big_vmem = vmem_cap >= 100 * 1024 * 1024
        tile_target = (8 if big_vmem else 4) * 1024 * 1024
        bn = tile_target // (row_bytes_x + row_bytes_t)
        bn = max(8, (bn // 8) * 8)
        bn = min(bn, n_pad8)
    else:
        bn = block_n
    assert bn % 8 == 0, "BLOCK_N must be a multiple of 8 (sublane tiling)"

    num_blocks = (n + bn - 1) // bn
    # 2-way TensorCore split only when the chip actually has >1 TC (megacore).
    g_splits = 2 if (cores >= 2 and num_blocks >= 2) else 1
    steps = (num_blocks + g_splits - 1) // g_splits
    last_block = num_blocks - 1

    # Real (lane-padded, double-buffered) VMEM working set.
    working = (2 * bn * row_bytes_x         # logits double buffer
               + 2 * bn * row_bytes_t       # target double buffer
               + 8 * c_pad * 4              # accumulator scratch
               + 2 * 8 * 128 * 4)           # output buffers
    vmem_limit = int(min(int(vmem_cap * 0.85),
                         max(32 * 1024 * 1024, working + 2 * 1024 * 1024)))

    cost = pl.CostEstimate(
        flops=int(7 * n * c),
        transcendentals=int(2 * n * c),
        bytes_accessed=int(n * c * itemsize + n * 4 + g_splits * 8 * 128 * 4),
    )

    kern = partial(_bce_smooth_kernel, smoothing=float(smoothing), n_rows=n,
                   block_n=bn, steps=steps, two_d=(g_splits > 1))

    if g_splits > 1:
        grid = (g_splits, steps)

        def blk_index(g, s):
            # Clamp so out-of-range tail slots re-read the last real block
            # (their contribution is fully masked in-kernel).
            return (jnp.minimum(g * steps + s, last_block), 0)

        out_index = lambda g, s: (g, 0, 0)
        dim_sem = ("parallel", "arbitrary")
    else:
        grid = (steps,)

        def blk_index(s):
            return (s, 0)

        out_index = lambda s: (0, 0, 0)
        dim_sem = ("arbitrary",)

    partials = pl.pallas_call(
        kern,
        out_shape=jax.ShapeDtypeStruct((g_splits, 8, 128), jnp.float32),
        grid_spec=pltpu.PrefetchScalarGridSpec(
            num_scalar_prefetch=0,
            grid=grid,
            in_specs=[
                pl.BlockSpec((bn, c), blk_index),   # logits tile
                pl.BlockSpec((bn, 1), blk_index),   # class-index tile
            ],
            out_specs=pl.BlockSpec((1, 8, 128), out_index),
            scratch_shapes=[pltpu.VMEM((8, c), jnp.float32)],
        ),
        compiler_params=pltpu.CompilerParams(
            dimension_semantics=dim_sem,
            vmem_limit_bytes=vmem_limit,
        ),
        cost_estimate=cost,
    )(x, tgt2d)

    total = jnp.sum(partials[:, 0, 0])            # one scalar per split
    loss = total / jnp.float32(n * c)             # true N*C divisor
    return loss.astype(x.dtype)


if __name__ == "__main__":
    key = jax.random.PRNGKey(0)

    def ref_loss(x, tgt, smoothing):
        n, c = x.shape
        off = smoothing / c
        on = 1.0 - smoothing + off
        t = jnp.full((n, c), off, dtype=jnp.float32).at[
            jnp.arange(n), tgt].set(on)
        xf = x.astype(jnp.float32)
        return jnp.mean(jnp.maximum(xf, 0.0) - xf * t
                        + jnp.log1p(jnp.exp(-jnp.abs(xf))))

    k1, k2, k3, k4, k5, k6 = jax.random.split(key, 6)

    # 1) small (batch, num_classes), single tile, fast (unmasked) path only
    N, C = 8, 16
    x = jax.random.normal(k1, (N, C), dtype=jnp.float32)
    tgt = jax.random.randint(k2, (N,), 0, C, dtype=jnp.int32)
    loss = binary_cross_entropy(x, tgt, smoothing=0.1)
    jax.block_until_ready(loss)
    assert jnp.allclose(loss, ref_loss(x, tgt, 0.1), atol=1e-5, rtol=1e-5), loss

    # 2) N not a multiple of 8 -> exercises the masked tail path
    N, C = 13, 10
    x = jax.random.normal(k3, (N, C), dtype=jnp.float32)
    tgt = jax.random.randint(k4, (N,), 0, C, dtype=jnp.int32)
    loss = binary_cross_entropy(x, tgt, smoothing=0.1)
    jax.block_until_ready(loss)
    assert jnp.allclose(loss, ref_loss(x, tgt, 0.1), atol=1e-5, rtol=1e-5), loss

    # 3) multi-tile; on multi-TC chips also exercises the 2-way split and a
    #    clamped, fully masked tail slot
    N, C = 40, 16
    x = jax.random.normal(k5, (N, C), dtype=jnp.float32)
    tgt = jax.random.randint(k6, (N,), 0, C, dtype=jnp.int32)
    loss = binary_cross_entropy(x, tgt, smoothing=0.1, block_n=8)
    jax.block_until_ready(loss)
    assert jnp.allclose(loss, ref_loss(x, tgt, 0.1), atol=1e-5, rtol=1e-5), loss

    # 4) bf16 logits path (in-kernel upcast); looser tolerance for bf16 output
    x_bf16 = x.astype(jnp.bfloat16)
    loss_bf16 = binary_cross_entropy(x_bf16, tgt, smoothing=0.1, block_n=8)
    jax.block_until_ready(loss_bf16)
    assert jnp.allclose(loss_bf16.astype(jnp.float32),
                        ref_loss(x_bf16, tgt, 0.1), atol=1e-2), loss_bf16

    print("KERNEL_OK")
</pallas_src>

<mosaic_0001>
module attributes {stable_mosaic.version = 11 : i64} {
  func.func @_bce_smooth_kernel(%arg0: i32, %arg1: memref<8x16xf32, #tpu.memory_space<vmem>>, %arg2: memref<8x1xi32, #tpu.memory_space<vmem>>, %arg3: memref<1x8x128xf32, #tpu.memory_space<vmem>>, %arg4: memref<8x16xf32, #tpu.memory_space<vmem>>) attributes {dimension_semantics = [#tpu.dimension_semantics<arbitrary>], iteration_bounds = array<i64: 1>, scalar_prefetch = 0 : i64, scratch_operands = 1 : i64, tpu.core_type = #tpu.core_type<tc>, window_params = [{transform_indices = @transform_0, window_bounds = array<i64: 8, 16>}, {transform_indices = @transform_1, window_bounds = array<i64: 8, 1>}, {pipeline_mode = #tpu.pipeline_mode<synchronous>, transform_indices = @transform_2, window_bounds = array<i64: 1, 8, 128>}]} {
    %c0_i32 = arith.constant 0 : i32
    %0 = arith.cmpi eq, %arg0, %c0_i32 : i32
    %1 = arith.extui %0 : i1 to i32
    %c0_i32_0 = arith.constant 0 : i32
    %2 = arith.cmpi ne, %1, %c0_i32_0 : i32
    scf.if %2 {
      %cst_16 = arith.constant 0.000000e+00 : f32
      %34 = vector.broadcast %cst_16 : f32 to vector<8x16xf32>
      %c0_17 = arith.constant 0 : index
      %c0_18 = arith.constant 0 : index
      %35 = vector.load %arg4[%c0_17, %c0_18] : memref<8x16xf32, #tpu.memory_space<vmem>>, vector<8x16xf32>
      tpu.vector_store %arg4[%c0_17, %c0_18], %34 {strides = array<i32>} : memref<8x16xf32, #tpu.memory_space<vmem>>, vector<8x16xf32>,
    } else {
    }
    %c0 = arith.constant 0 : index
    %c0_1 = arith.constant 0 : index
    %3 = vector.load %arg1[%c0, %c0_1] : memref<8x16xf32, #tpu.memory_space<vmem>>, vector<8x16xf32>
    %c0_2 = arith.constant 0 : index
    %c0_3 = arith.constant 0 : index
    %4 = vector.load %arg2[%c0_2, %c0_3] : memref<8x1xi32, #tpu.memory_space<vmem>>, vector<8x1xi32>
    %5 = tpu.iota {dimensions = array<i32: 1>} : vector<8x16xi32>
    %6 = vector.broadcast %4 : vector<8x1xi32> to vector<8x16xi32>
    %7 = arith.cmpi eq, %5, %6 : vector<8x16xi32>
    %cst = arith.constant 9.062500e-01 : f32
    %cst_4 = arith.constant 6.250000e-03 : f32
    %8 = vector.broadcast %cst : f32 to vector<8x16xf32>
    %9 = vector.broadcast %cst_4 : f32 to vector<8x16xf32>
    %10 = arith.select %7, %8, %9 : vector<8x16xi1>, vector<8x16xf32>
    %cst_5 = arith.constant 0.000000e+00 : f32
    %11 = vector.broadcast %cst_5 : f32 to vector<8x16xf32>
    %12 = arith.maximumf %3, %11 : vector<8x16xf32>
    %13 = arith.mulf %3, %10 : vector<8x16xf32>
    %14 = arith.subf %12, %13 : vector<8x16xf32>
    %15 = math.absf %3 : vector<8x16xf32>
    %cst_6 = arith.constant 0.000000e+00 : f32
    %16 = vector.broadcast %cst_6 : f32 to vector<8x16xf32>
    %17 = arith.subf %16, %15 : vector<8x16xf32>
    %18 = math.exp %17 : vector<8x16xf32>
    %19 = math.log1p %18 : vector<8x16xf32>
    %20 = arith.addf %14, %19 : vector<8x16xf32>
    %c0_i32_7 = arith.constant 0 : i32
    %21 = arith.addi %c0_i32_7, %arg0 : i32
    %c8_i32 = arith.constant 8 : i32
    %22 = arith.muli %21, %c8_i32 : i32
    %c8_i32_8 = arith.constant 8 : i32
    %23 = arith.addi %22, %c8_i32_8 : i32
    %c8_i32_9 = arith.constant 8 : i32
    %24 = arith.cmpi sle, %23, %c8_i32_9 : i32
    %25 = arith.extui %24 : i1 to i32
    %c0_i32_10 = arith.constant 0 : i32
    %26 = arith.cmpi ne, %25, %c0_i32_10 : i32
    scf.if %26 {
      %c0_16 = arith.constant 0 : index
      %c0_17 = arith.constant 0 : index
      %34 = vector.load %arg4[%c0_16, %c0_17] : memref<8x16xf32, #tpu.memory_space<vmem>>, vector<8x16xf32>
      %35 = vector.shape_cast %20 : vector<8x16xf32> to vector<1x8x16xf32>
      %cst_18 = arith.constant dense<0.000000e+00> : vector<8x16xf32>
      %36 = vector.multi_reduction <add>, %35, %cst_18 [0] : vector<1x8x16xf32> to vector<8x16xf32>
      %37 = arith.addf %34, %36 : vector<8x16xf32>
      %c0_19 = arith.constant 0 : index
      %c0_20 = arith.constant 0 : index
      %38 = vector.load %arg4[%c0_19, %c0_20] : memref<8x16xf32, #tpu.memory_space<vmem>>, vector<8x16xf32>
      tpu.vector_store %arg4[%c0_19, %c0_20], %37 {strides = array<i32>} : memref<8x16xf32, #tpu.memory_space<vmem>>, vector<8x16xf32>,
    } else {
    }
    %c8_i32_11 = arith.constant 8 : i32
    %27 = arith.addi %22, %c8_i32_11 : i32
    %c8_i32_12 = arith.constant 8 : i32
    %28 = arith.cmpi sgt, %27, %c8_i32_12 : i32
    %29 = arith.extui %28 : i1 to i32
    %c0_i32_13 = arith.constant 0 : i32
    %30 = arith.cmpi ne, %29, %c0_i32_13 : i32
    scf.if %30 {
      %34 = tpu.iota {dimensions = array<i32: 0>} : vector<8x1xi32>
      %35 = vector.broadcast %22 : i32 to vector<8x1xi32>
      %36 = arith.addi %34, %35 : vector<8x1xi32>
      %c8_i32_16 = arith.constant 8 : i32
      %37 = vector.broadcast %c8_i32_16 : i32 to vector<8x1xi32>
      %38 = arith.cmpi slt, %36, %37 : vector<8x1xi32>
      %cst_17 = arith.constant 0.000000e+00 : f32
      %39 = vector.shape_cast %38 : vector<8x1xi1> to vector<8x1xi1>
      %40 = vector.broadcast %39 : vector<8x1xi1> to vector<8x16xi1>
      %41 = vector.broadcast %cst_17 : f32 to vector<8x16xf32>
      %42 = arith.select %40, %20, %41 : vector<8x16xi1>, vector<8x16xf32>
      %c0_18 = arith.constant 0 : index
      %c0_19 = arith.constant 0 : index
      %43 = vector.load %arg4[%c0_18, %c0_19] : memref<8x16xf32, #tpu.memory_space<vmem>>, vector<8x16xf32>
      %44 = vector.shape_cast %42 : vector<8x16xf32> to vector<1x8x16xf32>
      %cst_20 = arith.constant dense<0.000000e+00> : vector<8x16xf32>
      %45 = vector.multi_reduction <add>, %44, %cst_20 [0] : vector<1x8x16xf32> to vector<8x16xf32>
      %46 = arith.addf %43, %45 : vector<8x16xf32>
      %c0_21 = arith.constant 0 : index
      %c0_22 = arith.constant 0 : index
      %47 = vector.load %arg4[%c0_21, %c0_22] : memref<8x16xf32, #tpu.memory_space<vmem>>, vector<8x16xf32>
      tpu.vector_store %arg4[%c0_21, %c0_22], %46 {strides = array<i32>} : memref<8x16xf32, #tpu.memory_space<vmem>>, vector<8x16xf32>,
    } else {
    }
    %c0_i32_14 = arith.constant 0 : i32
    %31 = arith.cmpi eq, %arg0, %c0_i32_14 : i32
    %32 = arith.extui %31 : i1 to i32
    %c0_i32_15 = arith.constant 0 : i32
    %33 = arith.cmpi ne, %32, %c0_i32_15 : i32
    scf.if %33 {
      %c0_16 = arith.constant 0 : index
      %c0_17 = arith.constant 0 : index
      %34 = vector.load %arg4[%c0_16, %c0_17] : memref<8x16xf32, #tpu.memory_space<vmem>>, vector<8x16xf32>
      %35 = vector.shape_cast %34 : vector<8x16xf32> to vector<1x8x16xf32>
      %cst_18 = arith.constant dense<0.000000e+00> : vector<1xf32>
      %36 = vector.multi_reduction <add>, %35, %cst_18 [1, 2] : vector<1x8x16xf32> to vector<1xf32>
      %37 = vector.shape_cast %36 : vector<1xf32> to vector<1x1x1xf32>
      %38 = vector.extract %37[0, 0, 0] : f32 from vector<1x1x1xf32>
      %39 = vector.broadcast %38 : f32 to vector<1x8x128xf32>
      %c0_19 = arith.constant 0 : index
      %c0_20 = arith.constant 0 : index
      %c0_21 = arith.constant 0 : index
      %40 = vector.load %arg3[%c0_19, %c0_20, %c0_21] : memref<1x8x128xf32, #tpu.memory_space<vmem>>, vector<1x8x128xf32>
      tpu.vector_store %arg3[%c0_19, %c0_20, %c0_21], %39 {strides = array<i32>} : memref<1x8x128xf32, #tpu.memory_space<vmem>>, vector<1x8x128xf32>,
    } else {
    }
    return
  }
  func.func @transform_0(%arg0: i32) -> (i32, i32) {
    %c0_i32 = arith.constant 0 : i32
    %c0_i32_0 = arith.constant 0 : i32
    return %arg0, %c0_i32 : i32, i32
  }
  func.func @transform_1(%arg0: i32) -> (i32, i32) {
    %c0_i32 = arith.constant 0 : i32
    %c0_i32_0 = arith.constant 0 : i32
    return %arg0, %c0_i32 : i32, i32
  }
  func.func @transform_2(%arg0: i32) -> (i32, i32, i32) {
    %c0_i32 = arith.constant 0 : i32
    %c0_i32_0 = arith.constant 0 : i32
    %c0_i32_1 = arith.constant 0 : i32
    %c0_i32_2 = arith.constant 0 : i32
    return %c0_i32, %c0_i32_0, %c0_i32_1 : i32, i32, i32
  }
}

</mosaic_0001>

<bundles_post_ra>
// kernel: tpu_custom_call.1
= control target key start
LH: loop header
LB: loop body
LE: loop exit
PB: predicated region body
PF: predicated region fallthrough
CT: control target
= control target key end

     0   :  { %s173_s0 = inlined_call_operand.vmem [shape: f32[8,16], index: 0, kind: input, shape index: {}]   ;;  %s174_s1 = inlined_call_operand.vmem [shape: s32[8,1], index: 1, kind: input, shape index: {}]   ;;  %s175_s2 = inlined_call_operand.hbm [shape: f32[1,8,128], index: 2, kind: output, shape index: {}]  }
   0x1   :  { %v19_v0 = vld [vmem:[%s174_s1] sm:$0xff] }
   0x2   :  { %7 = vsyncpa [#allocation4], 0  ;;  %v142_v1 = vmov 0   ;;  %v18_v2 = vld [vmem:[%s173_s0] sm:$0xff]  ;;  %vm16_vm0 = vcmask 130048   ;;  %v143_v4 = vmov 0.0   ;;  %v20_v10 = vlaneseq }
   0x3   :  { %111 = vset.pattern.permute.xlu0 %v142_v1  ;;  %v30_v3 = vand.u32 2147483647, %v18_v2  ;;  %17 = vst.msk [vmem:[#allocation2] sm:$0xff] %vm16_vm0, %v143_v4  ;;  %v27_v18 = vmax.f32 %v18_v2, 0.0  ;;  %v144_v19 = vmov 0.00625  }
   0x4   :  { %23 = vperm.xlu0 %111, %v19_v0   ;;  %v21_v13 = vand.u32 127, %v20_v10  ;;  %s145_s0 = smov [#allocation3]   ;;  %s96_s15 = sshll.u32 %s175_s2, 4  ;;  %s97_s15 = int_to_ptr.hbm [resolvable:$true] %s96_s15 }
   0x5   :  { %v31_v5 = vsub.f32 0.0, %v30_v3  ;;  %s94_s1 = sshll.u32 %s145_s0, 4  ;;  %s95_s1 = int_to_ptr.vmem [resolvable:$true] %s94_s1 }
   0x7   :  { %v32_v6 = vmul.f32 1.442695, %v31_v5 }
   0x9   :  { %112 = vpow2.f32 %v32_v6 }
   0xa   :  { %v50_v24 = vld [vmem:[#allocation2] sm:$0xff] }
   0xf   :  { %v113_v7 = vpop.eup %112 }
  0x10   :  { %v34_v8 = vadd.f32 1.0, %v113_v7  ;;  %v37_v9 = vmul.f32 -0.5, %v113_v7  ;;  %v40_v14 = vand.u32 2147483647, %v113_v7 }
  0x12   :  { %114 = vlog2.f32 %v34_v8  ;;  %v38_v11 = vadd.f32 1.0, %v37_v9  ;;  %vm41_vm2 = vcmp.lt.f32.partialorder %v40_v14, 0.0004427343 }
  0x14   :  { %v39_v17 = vmul.f32 %v113_v7, %v38_v11 }
  0x18   :  { %v115_v12 = vpop.eup %114 }
  0x19   :  { %v36_v16 = vmul.f32 0.6931472, %v115_v12 }
  0x1b   :  { %v42_v22 = vsel %vm41_vm2, %v39_v17, %v36_v16 }
  0x76   :  { %v24_v15 = vpop.permute.xlu0 %23 }
  0x77   :  { %vm25_vm1 = vcmp.eq.s32.totalorder %v21_v13, %v24_v15 }
  0x78   :  { %v26_v20 = vsel %vm25_vm1, 0.90625, %v144_v19 }
  0x79   :  { %v28_v21 = vmul.f32 %v26_v20, %v18_v2 }
  0x7b   :  { %v29_v23 = vsub.f32 %v27_v18, %v28_v21 }
  0x7d   :  { %v43_v25 = vadd.f32 %v42_v22, %v29_v23 }
  0x7f   :  { %v52_v26 = vadd.f32 %v50_v24, %v43_v25 }
  0x81   :  { %54 = vst.msk [vmem:[#allocation2] sm:$0xff] %vm16_vm0, %v52_v26 }
  0x88   :  { %v75_v27 = vld [vmem:[#allocation2] sm:$0xff] }
  0x89   :  { %v77_v28 = vsel %vm16_vm0, %v75_v27, 0.0 }
  0x8a   :  { %78 = vadd.xlane.f32.xlu0 %v77_v28 }
  0xfd   :  { %v79_v29 = vpop.xlane.xlu0 %78 }
  0xfe   :  { %v80_v30 = vrot.slane %v79_v29, 4 }
 0x100   :  { %v81_v31 = vadd.f32 %v80_v30, %v79_v29 }
 0x102   :  { %v82_v32 = vrot.slane %v81_v31, 2 }
 0x104   :  { %v83_v33 = vadd.f32 %v82_v32, %v81_v31 }
 0x106   :  { %v84_v34 = vrot.slane %v83_v33, 1 }
 0x108   :  { %v85_v35 = vadd.f32 %v84_v34, %v83_v33 }
 0x10a   :  { %105 = vpush %v85_v35 }
 0x13b   :  { %s106_s16 = spop %105 }
 0x13c   :  { %v87_v36 = vstv %s106_s16 }
 0x13d   :  { %88 = vst [vmem:[#allocation3] sm:$0xff] %v87_v36 }
 0x13e   :  { %99 = dma.vmem_to_hbm [thread:$0]  %s95_s1, 128, %s97_s15, [#allocation4]  }
 0x13f   :  { %140 = dma.done.wait [#allocation4], 128  }
 0x140   :  { %141 = vsyncadd [#allocation4], 4294967168 }
 0x141   :  { %104 = vsyncpa [#allocation4], 1 }

</bundles_post_ra>
